<compile_context>
chip_gen: v7x
topology: tpu7x:2x2x1
jax: 0.10.0
libtpu: 0.0.40
codegen_flags: <defaults>
</compile_context>

<pallas_src>
import jax
import jax.numpy as jnp
from jax.experimental import pallas as pl
from jax.experimental.pallas import tpu as pltpu


def _conv3x3_kernel(w_ref, b_ref, x_ref, halo_ref, o_ref):
    # w_ref:    SMEM (9,)          flattened 3x3 weights, K[i, j] = w_ref[3*i + j]
    # b_ref:    SMEM (1,)          bias
    # x_ref:    VMEM (1, tile_h, W) input rows of this (batch, H-tile) block
    # halo_ref: VMEM (1, 1, 2, W)  row above / row below the tile (zeros at the
    #                              image border, real neighbour rows otherwise)
    # o_ref:    VMEM (1, W, tile_h) transposed output block of (B, W, H)
    tile_h = x_ref.shape[1]
    W = x_ref.shape[2]

    # Hoist every SMEM scalar read (one read per weight).
    k00, k01, k02 = w_ref[0], w_ref[1], w_ref[2]
    k10, k11, k12 = w_ref[3], w_ref[4], w_ref[5]
    k20, k21, k22 = w_ref[6], w_ref[7], w_ref[8]
    bias = b_ref[0]

    x = x_ref[0]            # (tile_h, W)
    halo = halo_ref[0, 0]   # (2, W): [row above tile, row below tile]

    # Vertical neighbours via sublane shifts.  The halo rows are folded directly
    # into the shift (no iota / masked adds): they are zero at the image border,
    # which implements padding=1 along H.
    x_up = jnp.concatenate([halo[0:1], x[: tile_h - 1]], axis=0)   # x[h-1, w]
    x_dn = jnp.concatenate([x[1:], halo[1:2]], axis=0)             # x[h+1, w]

    # Combine the three kernel ROWS for each kernel COLUMN j:
    #   v_j[h, w] = sum_i K[i, j] * x[h+i-1, w]
    v0 = k00 * x_up + k10 * x + k20 * x_dn
    v1 = k01 * x_up + k11 * x + k21 * x_dn
    v2 = k02 * x_up + k12 * x + k22 * x_dn

    # Fused (tile_h, W) -> (W, tile_h) transpose: the horizontal (W-direction) taps
    # now become sublane shifts of the transposed planes, with explicit zero rows
    # implementing padding=1 along W.  No lane rolls, iotas or selects anywhere.
    t0 = v0.T               # (W, tile_h)
    t1 = v1.T
    t2 = v2.T
    zrow = jnp.zeros((1, tile_h), jnp.float32)
    left = jnp.concatenate([zrow, t0[: W - 1]], axis=0)    # v0[h, w-1]
    right = jnp.concatenate([t2[1:], zrow], axis=0)        # v2[h, w+1]

    # out[w, h] = y[h, w] = v0[h, w-1] + v1[h, w] + v2[h, w+1] + b
    o_ref[0] = (left + t1 + right + bias).astype(o_ref.dtype)


def _vmem_caps():
    """(per-block byte cap, vmem_limit_bytes) tuned per TPU generation."""
    try:
        vmem_phys = int(pltpu.get_tpu_info().vmem_capacity_bytes)
    except Exception:
        vmem_phys = 64 * 1024 * 1024          # conservative (v7x-sized VMEM)
    if vmem_phys >= 96 * 1024 * 1024:         # v5e / v6e: 128 MiB VMEM, HBM-bound
        return 6 * 1024 * 1024, 96 * 1024 * 1024
    return 2 * 1024 * 1024, 40 * 1024 * 1024  # v7x: 64 MiB VMEM, keep headroom


def _choose_tile_h(B, H, W, block_cap_bytes):
    """Pick an H tile: lane-dense 128-multiples for big (or B==1) images, else full H."""
    row_bytes = W * 4
    full_bytes = H * row_bytes
    # Tile when the full image is too big for one block, or when B == 1 and H allows
    # it (so the grid has >= 2 steps: pipeline depth + both v7x TensorCores busy).
    want_tiles = (full_bytes > block_cap_bytes) or (B == 1 and H >= 256)
    if want_tiles:
        for th in (2048, 1024, 512, 256, 128):
            if th < H and H % th == 0 and th * row_bytes <= block_cap_bytes:
                return th
    # TODO(synk): add W tiling (1-column halo) for very wide or H-ragged images so the
    # fallback never produces a block larger than the VMEM budget.
    return H


def conv2d_layers_forward(x, weight, bias):
    """Pallas equivalent of Conv2dLayers.forward.

    x:      (B, H, W) float   (input BEFORE unsqueeze(1); channel dim is 1)
    weight: (1, 1, 3, 3) float
    bias:   (1,) float
    returns (B, W, H) float32 (== conv.view(B, -1, W).transpose(1, 2) for C_out=1)
    """
    B, H, W = x.shape
    x = x.astype(jnp.float32)
    block_cap, vmem_limit = _vmem_caps()
    tile_h = _choose_tile_h(B, H, W, block_cap)
    n_t = H // tile_h

    # Per-tile halo rows: the row just above / just below each H tile (zeros at the
    # image border).  Only 2 rows per tile -> negligible HBM traffic.
    if n_t > 1:
        zrow = jnp.zeros((B, 1, W), jnp.float32)
        above = jnp.concatenate([zrow, x[:, tile_h - 1:H - 1:tile_h, :]], axis=1)
        below = jnp.concatenate([x[:, tile_h::tile_h, :], zrow], axis=1)
        halo = jnp.stack([above, below], axis=2)            # (B, n_t, 2, W)
    else:
        halo = jnp.zeros((B, 1, 2, W), jnp.float32)

    bytes_accessed = 4 * (B * H * W          # input, read once
                          + B * W * H        # output, written once
                          + B * n_t * 2 * W  # halo rows
                          + 10)              # weights + bias
    out = pl.pallas_call(
        _conv3x3_kernel,
        out_shape=jax.ShapeDtypeStruct((B, W, H), jnp.float32),
        grid=(B, n_t),
        in_specs=[
            pl.BlockSpec(memory_space=pltpu.MemorySpace.SMEM),       # weights (9,)
            pl.BlockSpec(memory_space=pltpu.MemorySpace.SMEM),       # bias (1,)
            pl.BlockSpec((1, tile_h, W), lambda b, t: (b, t, 0)),    # input rows
            pl.BlockSpec((1, 1, 2, W), lambda b, t: (b, t, 0, 0)),   # halo rows
        ],
        out_specs=pl.BlockSpec((1, W, tile_h), lambda b, t: (b, 0, t)),
        compiler_params=pltpu.CompilerParams(
            dimension_semantics=("parallel", "parallel"),
            vmem_limit_bytes=vmem_limit),
        cost_estimate=pl.CostEstimate(
            flops=18 * B * H * W,
            transcendentals=0,
            bytes_accessed=bytes_accessed),
    )(weight.reshape(9).astype(jnp.float32), bias.astype(jnp.float32), x, halo)
    return out


def _reference_forward(x, weight, bias):
    # Pure-JAX reference (lax conv == PyTorch cross-correlation) for correctness.
    x4 = x[:, None, :, :].astype(jnp.float32)   # (B, 1, H, W)
    y = jax.lax.conv_general_dilated(
        x4, weight.astype(jnp.float32), window_strides=(1, 1),
        padding=((1, 1), (1, 1)),
        dimension_numbers=("NCHW", "OIHW", "NCHW"),
        precision=jax.lax.Precision.HIGHEST)
    y = y + bias.reshape(1, 1, 1, 1)
    B, _, H, W = y.shape
    return jnp.transpose(y.reshape(B, H, W), (0, 2, 1))


if __name__ == "__main__":
    key = jax.random.PRNGKey(0)
    kx, kw, kb = jax.random.split(key, 3)

    B, H, W = 2, 16, 16
    x = jax.random.normal(kx, (B, H, W), dtype=jnp.float32)

    # Deterministic parameter init (Conv2d(1, 1, 3): weight (1,1,3,3), bias (1,))
    fan_in = 1 * 3 * 3
    bound = 1.0 / (fan_in ** 0.5)
    weight = jax.random.uniform(kw, (1, 1, 3, 3), jnp.float32, -bound, bound)
    bias = jax.random.uniform(kb, (1,), jnp.float32, -bound, bound)

    out = conv2d_layers_forward(x, weight, bias)
    out = jax.block_until_ready(out)

    ref = _reference_forward(x, weight, bias)
    assert out.shape == (B, W, H), out.shape
    assert jnp.allclose(out, ref, atol=1e-4, rtol=1e-4), "mismatch vs reference"

    print("KERNEL_OK")
</pallas_src>

<mosaic_0001>
module attributes {stable_mosaic.version = 11 : i64} {
  func.func @_conv3x3_kernel(%arg0: i32, %arg1: i32, %arg2: memref<9xf32, #tpu.memory_space<smem>>, %arg3: memref<1xf32, #tpu.memory_space<smem>>, %arg4: memref<1x16x16xf32, #tpu.memory_space<vmem>>, %arg5: memref<1x1x2x16xf32, #tpu.memory_space<vmem>>, %arg6: memref<1x16x16xf32, #tpu.memory_space<vmem>>) attributes {dimension_semantics = [#tpu.dimension_semantics<parallel>, #tpu.dimension_semantics<parallel>], iteration_bounds = array<i64: 2, 1>, scalar_prefetch = 0 : i64, scratch_operands = 0 : i64, tpu.core_type = #tpu.core_type<tc>, window_params = [{transform_indices = @transform_0, window_bounds = array<i64: 9>}, {transform_indices = @transform_1, window_bounds = array<i64: 1>}, {transform_indices = @transform_2, window_bounds = array<i64: 1, 16, 16>}, {transform_indices = @transform_3, window_bounds = array<i64: 1, 1, 2, 16>}, {transform_indices = @transform_4, window_bounds = array<i64: 1, 16, 16>}]} {
    %c0 = arith.constant 0 : index
    %0 = memref.load %arg2[%c0] : memref<9xf32, #tpu.memory_space<smem>>
    %c1 = arith.constant 1 : index
    %1 = memref.load %arg2[%c1] : memref<9xf32, #tpu.memory_space<smem>>
    %c2 = arith.constant 2 : index
    %2 = memref.load %arg2[%c2] : memref<9xf32, #tpu.memory_space<smem>>
    %c3 = arith.constant 3 : index
    %3 = memref.load %arg2[%c3] : memref<9xf32, #tpu.memory_space<smem>>
    %c4 = arith.constant 4 : index
    %4 = memref.load %arg2[%c4] : memref<9xf32, #tpu.memory_space<smem>>
    %c5 = arith.constant 5 : index
    %5 = memref.load %arg2[%c5] : memref<9xf32, #tpu.memory_space<smem>>
    %c6 = arith.constant 6 : index
    %6 = memref.load %arg2[%c6] : memref<9xf32, #tpu.memory_space<smem>>
    %c7 = arith.constant 7 : index
    %7 = memref.load %arg2[%c7] : memref<9xf32, #tpu.memory_space<smem>>
    %c8 = arith.constant 8 : index
    %8 = memref.load %arg2[%c8] : memref<9xf32, #tpu.memory_space<smem>>
    %c0_0 = arith.constant 0 : index
    %9 = memref.load %arg3[%c0_0] : memref<1xf32, #tpu.memory_space<smem>>
    %c0_1 = arith.constant 0 : index
    %c0_2 = arith.constant 0 : index
    %c0_3 = arith.constant 0 : index
    %10 = vector.load %arg4[%c0_1, %c0_2, %c0_3] : memref<1x16x16xf32, #tpu.memory_space<vmem>>, vector<1x16x16xf32>
    %11 = vector.shape_cast %10 : vector<1x16x16xf32> to vector<16x16xf32>
    %c0_4 = arith.constant 0 : index
    %c0_5 = arith.constant 0 : index
    %c0_6 = arith.constant 0 : index
    %c0_7 = arith.constant 0 : index
    %12 = vector.load %arg5[%c0_4, %c0_5, %c0_6, %c0_7] : memref<1x1x2x16xf32, #tpu.memory_space<vmem>>, vector<1x1x2x16xf32>
    %13 = vector.shape_cast %12 : vector<1x1x2x16xf32> to vector<2x16xf32>
    %14 = vector.extract_strided_slice %13 {offsets = [0, 0], sizes = [1, 16], strides = [1, 1]} : vector<2x16xf32> to vector<1x16xf32>
    %15 = vector.extract_strided_slice %11 {offsets = [0, 0], sizes = [15, 16], strides = [1, 1]} : vector<16x16xf32> to vector<15x16xf32>
    %16 = tpu.concatenate %14, %15 in 0 : vector<1x16xf32>, vector<15x16xf32> -> vector<16x16xf32>
    %17 = vector.extract_strided_slice %11 {offsets = [1, 0], sizes = [15, 16], strides = [1, 1]} : vector<16x16xf32> to vector<15x16xf32>
    %18 = vector.extract_strided_slice %13 {offsets = [1, 0], sizes = [1, 16], strides = [1, 1]} : vector<2x16xf32> to vector<1x16xf32>
    %19 = tpu.concatenate %17, %18 in 0 : vector<15x16xf32>, vector<1x16xf32> -> vector<16x16xf32>
    %20 = vector.broadcast %0 : f32 to vector<16x16xf32>
    %21 = arith.mulf %20, %16 : vector<16x16xf32>
    %22 = vector.broadcast %3 : f32 to vector<16x16xf32>
    %23 = arith.mulf %22, %11 : vector<16x16xf32>
    %24 = arith.addf %21, %23 : vector<16x16xf32>
    %25 = vector.broadcast %6 : f32 to vector<16x16xf32>
    %26 = arith.mulf %25, %19 : vector<16x16xf32>
    %27 = arith.addf %24, %26 : vector<16x16xf32>
    %28 = vector.broadcast %1 : f32 to vector<16x16xf32>
    %29 = arith.mulf %28, %16 : vector<16x16xf32>
    %30 = vector.broadcast %4 : f32 to vector<16x16xf32>
    %31 = arith.mulf %30, %11 : vector<16x16xf32>
    %32 = arith.addf %29, %31 : vector<16x16xf32>
    %33 = vector.broadcast %7 : f32 to vector<16x16xf32>
    %34 = arith.mulf %33, %19 : vector<16x16xf32>
    %35 = arith.addf %32, %34 : vector<16x16xf32>
    %36 = vector.broadcast %2 : f32 to vector<16x16xf32>
    %37 = arith.mulf %36, %16 : vector<16x16xf32>
    %38 = vector.broadcast %5 : f32 to vector<16x16xf32>
    %39 = arith.mulf %38, %11 : vector<16x16xf32>
    %40 = arith.addf %37, %39 : vector<16x16xf32>
    %41 = vector.broadcast %8 : f32 to vector<16x16xf32>
    %42 = arith.mulf %41, %19 : vector<16x16xf32>
    %43 = arith.addf %40, %42 : vector<16x16xf32>
    %44 = tpu.transpose %27, [1, 0] : vector<16x16xf32> -> vector<16x16xf32>
    %45 = tpu.transpose %35, [1, 0] : vector<16x16xf32> -> vector<16x16xf32>
    %46 = tpu.transpose %43, [1, 0] : vector<16x16xf32> -> vector<16x16xf32>
    %cst = arith.constant 0.000000e+00 : f32
    %47 = vector.broadcast %cst : f32 to vector<1x16xf32>
    %48 = vector.extract_strided_slice %44 {offsets = [0, 0], sizes = [15, 16], strides = [1, 1]} : vector<16x16xf32> to vector<15x16xf32>
    %49 = tpu.concatenate %47, %48 in 0 : vector<1x16xf32>, vector<15x16xf32> -> vector<16x16xf32>
    %50 = vector.extract_strided_slice %46 {offsets = [1, 0], sizes = [15, 16], strides = [1, 1]} : vector<16x16xf32> to vector<15x16xf32>
    %51 = tpu.concatenate %50, %47 in 0 : vector<15x16xf32>, vector<1x16xf32> -> vector<16x16xf32>
    %52 = arith.addf %49, %45 : vector<16x16xf32>
    %53 = arith.addf %52, %51 : vector<16x16xf32>
    %54 = vector.broadcast %9 : f32 to vector<16x16xf32>
    %55 = arith.addf %53, %54 : vector<16x16xf32>
    %c0_8 = arith.constant 0 : index
    %c0_9 = arith.constant 0 : index
    %c0_10 = arith.constant 0 : index
    %56 = vector.load %arg6[%c0_8, %c0_9, %c0_10] : memref<1x16x16xf32, #tpu.memory_space<vmem>>, vector<1x16x16xf32>
    %57 = vector.shape_cast %56 : vector<1x16x16xf32> to vector<16x16xf32>
    %58 = vector.shape_cast %55 : vector<16x16xf32> to vector<1x16x16xf32>
    tpu.vector_store %arg6[%c0_8, %c0_9, %c0_10], %58 {strides = array<i32>} : memref<1x16x16xf32, #tpu.memory_space<vmem>>, vector<1x16x16xf32>,
    return
  }
  func.func @transform_0(%arg0: i32, %arg1: i32) -> i32 {
    %c0_i32 = arith.constant 0 : i32
    %c0_i32_0 = arith.constant 0 : i32
    return %c0_i32 : i32
  }
  func.func @transform_1(%arg0: i32, %arg1: i32) -> i32 {
    %c0_i32 = arith.constant 0 : i32
    %c0_i32_0 = arith.constant 0 : i32
    return %c0_i32 : i32
  }
  func.func @transform_2(%arg0: i32, %arg1: i32) -> (i32, i32, i32) {
    %c0_i32 = arith.constant 0 : i32
    %c0_i32_0 = arith.constant 0 : i32
    return %arg0, %arg1, %c0_i32 : i32, i32, i32
  }
  func.func @transform_3(%arg0: i32, %arg1: i32) -> (i32, i32, i32, i32) {
    %c0_i32 = arith.constant 0 : i32
    %c0_i32_0 = arith.constant 0 : i32
    %c0_i32_1 = arith.constant 0 : i32
    return %arg0, %arg1, %c0_i32, %c0_i32_0 : i32, i32, i32, i32
  }
  func.func @transform_4(%arg0: i32, %arg1: i32) -> (i32, i32, i32) {
    %c0_i32 = arith.constant 0 : i32
    %c0_i32_0 = arith.constant 0 : i32
    return %arg0, %c0_i32, %arg1 : i32, i32, i32
  }
}

</mosaic_0001>

<bundles_post_ra>
// kernel: tpu_custom_call.1
= control target key start
LH: loop header
LB: loop body
LE: loop exit
PB: predicated region body
PF: predicated region fallthrough
CT: control target
= control target key end

     0   :  { %s1129_s0 = inlined_call_operand.vmem [shape: f32[9], index: 0, kind: input, shape index: {}]   ;;  %s1130_s1 = inlined_call_operand.<no memory space> [shape: f32[1], index: 1, kind: input, shape index: {}]   ;;  %s1131_s2 = inlined_call_operand.hbm [shape: f32[2,16,16], index: 2, kind: input, shape index: {}]   ;;  %s1132_s3 = inlined_call_operand.vmem [shape: f32[2,1,2,16], index: 3, kind: input, shape index: {}]   ;;  %s1133_s4 = inlined_call_operand.hbm [shape: f32[2,16,16], index: 4, kind: output, shape index: {}]  }
   0x1   :  { %9 = sst [smem:[#allocation2]] %s1130_s1 }
   0x2   :  { %10 = vsyncpa [#allocation6], 0 }
   0x3   :  { %11 = vsyncpa [#allocation4], 0 }
   0x4   :  { %13 = vsyncpa [#allocation4 + $0x1], 0 }
   0x5   :  { %14 = vsyncpa [#allocation5], 0 }
   0x6   :  { %16 = vsyncpa [#allocation5 + $0x1], 0  ;;  %s873_s17 = smov 0   ;;  %s875_s18 = smov 0  }
   0x7   :  { %s877_s19 = smov 0   ;;  %s879_s20 = smov 0  }
   0x8   :  { %s881_s21 = smov 0   ;;  %s883_s22 = smov 0  }
   0x9 LB: > { %s599_s1 = sadd.s32 4294967295, %s836_s22   ;;  %s600_s23 = sadd.s32 4294967294, %s836_s22   ;;  %s836_s22 = sphi %s883_s22, %s22_s22   ;;  %s832_s21 = sphi %s881_s21, %s1156_s21   ;;  %s828_s20 = sphi %s879_s20, %s1155_s20   ;;  %s824_s19 = sphi %s877_s19, %s1154_s19   ;;  %s820_s18 = sphi %s875_s18, %s1153_s18   ;;  %s816_s17 = sphi %s873_s17, %s1152_s17  }
   0xa   : > { %s85_s24 = sadd.s32 1, %s824_s19  ;;  %p92_p0 = scmp.ne.s32.totalorder %s824_s19, %s820_s18 }
   0xb   : > { %p93_p1 = scmp.eq.s32.totalorder %s836_s22, 0  ;;  %p98_p2 = scmp.ne.s32.totalorder %s820_s18, %s816_s17 }
   0xc   : > { %p911_p3 = scmp.eq.s32.totalorder %s599_s1, 0  ;;  %p152_p4 = scmp.eq.s32.totalorder %s599_s1, 1 }
   0xd   : > { %p915_p5 = por %p93_p1, %p92_p0  ;;  %p158_p6 = scmp.eq.s32.totalorder %s600_s23, 1 }
   0xe   : > { %s1138_s25 = scalar_select %p911_p3, 1, 0 }
   0xf   : > { %p921_p7 = por %p911_p3, %p98_p2  ;;  %p925_p8 = por %p152_p4, %p92_p0 }
  0x10   : > { %p929_p9 = por %p158_p6, %p98_p2  ;;  %p601_p10 = scmp.ge.s32.totalorder %s836_s22, 1 }
  0x11   : > { %s1140_s27 = scalar_select %p921_p7, 1, 0 }
  0x12   : > { %s1141_s28 = scalar_select %p925_p8, 1, 0 }
  0x13   : > { %s1142_s29 = scalar_select %p929_p9, 1, 0 }
  0x14   : > { %p165_p11 = scmp.lt.s32.totalorder %s836_s22, 3  ;;  %s178_s6 = sshll.u32 %s1129_s0, 4  ;;  %s179_s6 = int_to_ptr.vmem [resolvable:$true] %s178_s6 }
  0x15   : > { %p648_p0 = scmp.lt.s32.totalorder %s836_s22, 2  ;;  %s34_s10 = sadd.s32 1, %s832_s21 }
  0x16   : > { %p938_p12 = pnand %p601_p10, %p165_p11  ;;  %p959_p6 = scmp.ge.s32.totalorder %s34_s10, 2 }
  0x17   : > { %p948_p2 = pnand %p648_p0, %p915_p5  ;;  %s192_s12 = sand.u32 1, %s824_s19  }
  0x18   : > { %p635_p1 = pneg %p938_p12  ;;  %s705_s13 = scalar_lea.vmem %s179_s6, 16 }
  0x19   : > { %p706_p10 = scmp.ne.s32.totalorder %s179_s6, %s705_s13  ;;  %p713_p13 = scmp.lt.s32.totalorder %s179_s6, %s179_s6 }
  0x1a   : > { %p954_p4 = pnand %p635_p1, %p911_p3  ;;  %p714_p9 = scmp.lt.s32.totalorder %s705_s13, %s705_s13 }
  0x1c   : > { %p707_p11 = pneg %p954_p4  ;;  %p715_p8 = por %p714_p9, %p713_p13 }
  0x1e   : > { %p708_p5 = pnand %p707_p11, %p706_p10 }
  0x20   : > { %p709_p0 = pneg %p708_p5 }
  0x22   : > { %p716_p1 = pnand %p715_p8, %p709_p0 }
  0x24   : > { %719 = shalt.err (!%p716_p1)
}
  0x25   : > { %s838_s14 = smov [#allocation3]   ;;  %s1158_s10 = smov (%p959_p6, %s34_s10), 0 }
  0x26   : > { %638 = dma.vmem_to_smem (!%p954_p4), %s179_s6, 16, %s838_s14, [#allocation6]  }
  0x27   : > { %s604_s15 = sshll.u32 %s192_s12, 4  ;;  %s80_s16 = ssub.s32 %s832_s21, %s1158_s10 }
  0x28   : > { %p83_p9 = scmp.eq.s32.totalorder %s80_s16, 0  ;;  %s625_s1 = sshll.u32 %s832_s21, 8 }
  0x29   : > { %s978_s30 = scalar_lea.hbm %s1131_s2, %s625_s1  ;;  %s196_s5 = scalar_lea.vmem [#allocation7], %s604_s15 }
  0x2a   : > { %s205_s9 = sshll.u32 %s196_s5, 4  ;;  %s987_s11 = scalar_lea.sflag [#allocation4], %s192_s12  ;;  %s985_s9 = int_to_ptr.vmem [resolvable:$true] %s205_s9 }
  0x2b   : > { %s983_s6 = scalar_select %p83_p9, %s824_s19, %s85_s24  }
  0x2c   : > { %s720_s13 = scalar_lea.hbm %s978_s30, 256  ;;  %p722_p13 = pneg %p948_p2 }
  0x2d   : > { %p721_p8 = scmp.ne.s32.totalorder %s978_s30, %s720_s13  ;;  %s725_s15 = scalar_lea.hbm %s1131_s2, 512 }
  0x2e   : > { %p726_p10 = scmp.lt.u32.totalorder %s978_s30, %s1131_s2  ;;  %p727_p11 = scmp.lt.u32.totalorder %s725_s15, %s720_s13 }
  0x2f   : > { %p723_p4 = pnand %p722_p13, %p721_p8  ;;  %p729_p0 = scmp.lt.u32.totalorder %s720_s13, %s978_s30 }
  0x30   : > { %p728_p5 = por %p727_p11, %p726_p10 }
  0x31   : > { %p724_p6 = pneg %p723_p4 }
  0x32   : > { %p730_p1 = por %p729_p0, %p728_p5 }
  0x34   : > { %p731_p9 = pnand %p730_p1, %p724_p6 }
  0x36   : > { %734 = shalt.err (!%p731_p9)
}
  0x37   : > { %s735_s24 = scalar_lea.vmem %s985_s9, 256  ;;  %s839_s12 = smov [#allocation7]  }
  0x38   : > { %p736_p8 = scmp.ne.s32.totalorder %s985_s9, %s735_s24  ;;  %s740_s26 = sshll.u32 %s839_s12, 4  ;;  %s741_s26 = int_to_ptr.vmem [resolvable:$false] %s740_s26 }
  0x39   : > { %s742_s5 = scalar_lea.vmem %s741_s26, 512  ;;  %p743_p3 = scmp.lt.s32.totalorder %s985_s9, %s741_s26 }
  0x3a   : > { %p738_p4 = pnand %p736_p8, %p722_p13  ;;  %p744_p10 = scmp.lt.s32.totalorder %s742_s5, %s735_s24 }
  0x3c   : > { %p739_p7 = pneg %p738_p4  ;;  %p745_p11 = por %p744_p10, %p743_p3 }
  0x3e   : > { %p746_p5 = pnand %p745_p11, %p739_p7 }
  0x40   : > { %749 = shalt.err (!%p746_p5)
}
  0x41   : > { %s840_s13 = smov 128   ;;  %s841_s14 = smov 8  }
  0x42   : > { %642 = dma.hbm_to_vmem [thread:$0]  (!%p948_p2), %s978_s30, 256, %s985_s9, %s987_s11, %s840_s13, %s840_s13, %s841_s14  }
  0x43   : > { %227 = sbr.rel (%p938_p12) target bundleno = 257 (0x101), region = 36  ;;  %p1147_p13 = scmp.ne.s32.totalorder (!%p938_p12), %s1138_s25, 0 }
  0x4a   : > { %803 = dma.done.wait (%p1147_p13), [#allocation6], 16  }
  0x4b   : > { %805 = vsyncadd (%p1147_p13), [#allocation6], 4294967280  ;;  %s1022_s16 = sand.u32 1, %s820_s18   ;;  %p1148_p3 = scmp.ne.s32.totalorder %s1140_s27, 0 }
  0x4c   : > { %s609_s15 = sshll.u32 %s1022_s16, 4  ;;  %s234_s1 = scalar_lea.sflag [#allocation4], %s1022_s16 }
  0x4d   : > { %s237_s8 = scalar_lea.vmem [#allocation7], %s609_s15 }
  0x4e   : > { %807 = dma.done.wait (%p1148_p3), %s234_s1, 256  }
  0x4f   : > { %809 = vsyncadd (%p1148_p3), %s234_s1, 4294967040 }
  0x50   : > { %242 = sfence }
  0x51   : > { %p271_p7 = scmp.lt.s32.totalorder %s828_s20, 1  ;;  %s1033_s25 = sld [smem:[#allocation3]]  ;;  %v288_v0 = vld [vmem:[%s237_s8] sm:$0xff]  ;;  %v289_v1 = vld [vmem:[%s237_s8 + $0x8] sm:$0xff]  ;;  %vm300_vm0 = vcmask 1046528   ;;  %vm293_vm1 = vcmask 1040384  }
  0x52   : > { %s1035_s7 = sld [smem:[#allocation3 + $0x3]]  ;;  %s1037_s30 = sld [smem:[#allocation3 + $0x6]]  ;;  %v301_v2 = vrot.slane %v288_v0, 1  ;;  %v302_v3 = vrot.slane %v289_v1, 1  ;;  %v295_v4 = vrot.slane %v289_v1, 7  ;;  %v294_v5 = vrot.slane %v288_v0, 7 }
  0x53   : > { %s272_s9 = scalar_select %p271_p7, %s828_s20, 1  ;;  %vm468_vm2 = vcmask 130048  }
  0x54   : > { %s1040_s27 = sld [smem:[#allocation3 + $0x2]]  ;;  %s1042_s11 = sld [smem:[#allocation3 + $0x5]]  ;;  %v303_v6 = vsel %vm300_vm0, %v301_v2, %v302_v3  ;;  %v296_v7 = vsel %vm293_vm1, %v294_v5, %v295_v4 }
  0x55   : > { %s611_s23 = sshll.u32 %s272_s9, 1  ;;  %s1044_s24 = sld [smem:[#allocation3 + $0x8]] }
  0x56   : > { %s277_s5 = scalar_lea.vmem %s1132_s3, %s611_s23  ;;  %s1051_s13 = sld [smem:[#allocation3 + $0x1]] }
  0x57   : > { %v290_v8 = vld [vmem:[%s277_s5] sm:$0x3]  ;;  %v310_v9 = vstv %s1033_s25  ;;  %s1054_s14 = sld [smem:[#allocation3 + $0x4]]  ;;  %s1056_s1 = sld [smem:[#allocation3 + $0x7]] }
  0x58   : > { %v299_v10 = vsel %vm293_vm1, %v290_v8, %v294_v5  ;;  %v307_v11 = vrot.slane %v290_v8, 2  ;;  %v313_v12 = vstv %s1035_s7  ;;  %v318_v13 = vstv %s1037_s30  ;;  %s287_s8 = sld [smem:[#allocation2]]  ;;  %s626_s25 = sshll.u32 %s828_s20, 8 }
  0x59   : > { %v311_v14 = vmul.f32 %v310_v9, %v299_v10  ;;  %v314_v15 = vmul.f32 %v313_v12, %v288_v0  ;;  %v319_v16 = vmul.f32 %v318_v13, %v303_v6  ;;  %v312_v17 = vmul.f32 %v310_v9, %v296_v7  ;;  %s269_s7 = scalar_lea.vmem [#allocation8], %s609_s15  ;;  %s472_s23 = scalar_lea.sflag [#allocation5], %s1022_s16 }
  0x5a   : > { %v336_v18 = vstv %s1040_s27  ;;  %v339_v19 = vstv %s1042_s11  ;;  %v309_v20 = vsel %vm300_vm0, %v302_v3, %v307_v11  ;;  %v315_v21 = vmul.f32 %v313_v12, %v289_v1  ;;  %s486_s30 = sshll.u32 %s269_s7, 4  ;;  %s1078_s11 = scalar_lea.hbm %s1133_s4, %s626_s25  ;;  %s1080_s30 = int_to_ptr.vmem [resolvable:$true] %s486_s30 }
  0x5b   : > { %v316_v22 = vadd.f32 %v314_v15, %v311_v14  ;;  %v337_v23 = vmul.f32 %v336_v18, %v299_v10  ;;  %v340_v24 = vmul.f32 %v339_v19, %v288_v0  ;;  %v344_v25 = vstv %s1044_s24  ;;  %s750_s24 = scalar_lea.vmem %s1080_s30, 256  ;;  %p1149_p2 = scmp.ne.s32.totalorder %s1141_s28, 0 }
  0x5c   : > { %v345_v26 = vmul.f32 %v344_v25, %v303_v6  ;;  %v317_v27 = vadd.f32 %v315_v21, %v312_v17  ;;  %v320_v28 = vmul.f32 %v318_v13, %v309_v20  ;;  %v338_v29 = vmul.f32 %v336_v18, %v296_v7  ;;  %p751_p12 = scmp.ne.s32.totalorder %s1080_s30, %s750_s24  ;;  %s842_s20 = smov [#allocation8]  }
  0x5d   : > { %v321_v30 = vadd.f32 %v319_v16, %v316_v22  ;;  %v342_v31 = vadd.f32 %v340_v24, %v337_v23  ;;  %v341_v32 = vmul.f32 %v339_v19, %v289_v1  ;;  %v346_v33 = vmul.f32 %v344_v25, %v309_v20  ;;  %s754_s15 = sshll.u32 %s842_s20, 4  ;;  %s755_s15 = int_to_ptr.vmem [resolvable:$false] %s754_s15 }
  0x5e   : > { %v322_v34 = vadd.f32 %v320_v28, %v317_v27  ;;  %v323_v35 = vstv %s1051_s13  ;;  %v326_v36 = vstv %s1054_s14  ;;  %v331_v37 = vstv %s1056_s1  ;;  %p752_p6 = pnand %p751_p12, %p1149_p2  ;;  %s756_s12 = scalar_lea.vmem %s755_s15, 512 }
  0x5f   : > { %349 = vxpose.xlu0.b32.start [1/2] (short) (narrow) %v321_v30, 16  ;;  %v347_v38 = vadd.f32 %v345_v26, %v342_v31  ;;  %v343_v39 = vadd.f32 %v341_v32, %v338_v29  ;;  %v324_v40 = vmul.f32 %v323_v35, %v299_v10  ;;  %v325_v41 = vmul.f32 %v323_v35, %v296_v7  ;;  %p757_p1 = scmp.lt.s32.totalorder %s1080_s30, %s755_s15  ;;  %p758_p9 = scmp.lt.s32.totalorder %s756_s12, %s750_s24 }
  0x60   : > { %v327_v42 = vmul.f32 %v326_v36, %v288_v0  ;;  %v328_v43 = vmul.f32 %v326_v36, %v289_v1  ;;  %v332_v44 = vmul.f32 %v331_v37, %v303_v6  ;;  %v333_v47 = vmul.f32 %v331_v37, %v309_v20  ;;  %p753_p0 = pneg %p752_p6 }
  0x61   : > { %413 = vxpose.xlu1.b32.start [1/2] (short) (narrow) %v347_v38, 16  ;;  %v348_v45 = vadd.f32 %v346_v33, %v343_v39  ;;  %v465_v63 = vstv %s287_s8  ;;  %p759_p8 = por %p758_p9, %p757_p1 }
  0x62   : > { %v329_v46 = vadd.f32 %v327_v42, %v324_v40  ;;  %v330_v48 = vadd.f32 %v328_v43, %v325_v41 }
  0x63   : > { %350 = vxpose.xlu0.b32.end [2/2] (short) (narrow) %v322_v34, 16  ;;  %p760_p4 = pnand %p759_p8, %p753_p0 }
  0x64   : > { %v334_v49 = vadd.f32 %v332_v44, %v329_v46  ;;  %v335_v50 = vadd.f32 %v333_v47, %v330_v48 }
  0x65   : > { %414 = vxpose.xlu1.b32.end [2/2] (short) (narrow) %v348_v45, 16 }
  0x67   : > { %381 = vxpose.xlu0.b32.start [1/2] (short) (narrow) %v334_v49, 16 }
  0x6b   : > { %382 = vxpose.xlu0.b32.end [2/2] (short) (narrow) %v335_v50, 16 }
  0xdf   : > { %v365_v51 = vpop.trf.xlu0 }
  0xe0   : > { %v447_v53 = vrot.slane %v365_v51, 7 }
  0xe1   : > { %v429_v52 = vpop.trf.xlu1 }
  0xe2   : > { %v455_v55 = vrot.slane %v429_v52, 1  ;;  %v452_v59 = vsel %vm293_vm1, 0.0, %v447_v53 }
  0xe3   : > { %v366_v54 = vpop.trf.xlu0 }
  0xe4   : > { %v448_v58 = vrot.slane %v366_v54, 7 }
  0xe5   : > { %v430_v56 = vpop.trf.xlu1 }
  0xe6   : > { %v456_v57 = vrot.slane %v430_v56, 1  ;;  %v449_v2 = vsel %vm293_vm1, %v447_v53, %v448_v58 }
  0xe7   : > { %v397_v60 = vpop.trf.xlu0 }
  0xe8   : > { %v457_v61 = vsel %vm300_vm0, %v455_v55, %v456_v57  ;;  %v461_v62 = vadd.f32 %v452_v59, %v397_v60  ;;  %v460_v1 = vsel %vm300_vm0, %v456_v57, 0.0 }
  0xea   : > { %v463_v0 = vadd.f32 %v461_v62, %v457_v61 }
  0xeb   : > { %v398_v3 = vpop.trf.xlu0 }
  0xec   : > { %v466_v4 = vadd.f32 %v465_v63, %v463_v0  ;;  %v462_v5 = vadd.f32 %v449_v2, %v398_v3 }
  0xee   : > { %469 = vst.msk [vmem:[%s269_s7] sm:$0xff] %vm468_vm2, %v466_v4  ;;  %v464_v6 = vadd.f32 %v462_v5, %v460_v1 }
  0xf0   : > { %v467_v7 = vadd.f32 %v465_v63, %v464_v6 }
  0xf2   : > { %470 = vst.msk [vmem:[%s269_s7 + $0x8] sm:$0xff] %vm468_vm2, %v467_v7 }
  0xf3   : > { %763 = shalt.err (!%p760_p4)
}
  0xf4   : > { %s764_s26 = scalar_lea.hbm %s1078_s11, 256  ;;  %s768_s14 = scalar_lea.hbm %s1133_s4, 512 }
  0xf5   : > { %p765_p10 = scmp.ne.s32.totalorder %s1078_s11, %s764_s26  ;;  %p769_p13 = scmp.lt.u32.totalorder %s1078_s11, %s1133_s4 }
  0xf6   : > { %p770_p3 = scmp.lt.u32.totalorder %s768_s14, %s764_s26  ;;  %p772_p12 = scmp.lt.u32.totalorder %s764_s26, %s1078_s11 }
  0xf7   : > { %p766_p11 = pnand %p765_p10, %p1149_p2 }
  0xf8   : > { %p771_p7 = por %p770_p3, %p769_p13 }
  0xf9   : > { %p767_p5 = pneg %p766_p11 }
  0xfa   : > { %p773_p6 = por %p772_p12, %p771_p7 }
  0xfc   : > { %p774_p0 = pnand %p773_p6, %p767_p5 }
  0xfe   : > { %777 = shalt.err (!%p774_p0)
}
  0xff   : > { %s843_s25 = smov 128   ;;  %s844_s7 = smov 8  }
 0x100   : > { %633 = dma.vmem_to_hbm [thread:$0]  (%p1149_p2), %s1080_s30, 256, %s1078_s11, %s472_s23, %s843_s25, %s843_s25, %s844_s7  }
 0x101 PF: > { %s501_s9 = sand.u32 1, %s816_s17   ;;  %p1150_p1 = scmp.ne.s32.totalorder %s1142_s29, 0 }
 0x102   : > { %p1151_p9 = scmp.ge.s32.totalorder %s836_s22, 2  ;;  %s502_s27 = scalar_lea.sflag [#allocation5], %s501_s9 }
 0x104   : > { %p644_p8 = pnand %p1151_p9, %p1150_p1 }
 0x106   : > { %811 = dma.done.wait (!%p644_p8), %s502_s27, 256  }
 0x107   : > { %813 = vsyncadd (!%p644_p8), %s502_s27, 4294967040  ;;  %s22_s22 = sadd.s32 1, %s836_s22   ;;  %s1152_s17 = smov %s820_s18 }
 0x108   : > { %p19_p4 = scmp.ge.s32.totalorder %s22_s22, 4   ;;  %s1153_s18 = smov %s824_s19 }
 0x109   : > { %s1154_s19 = smov %s983_s6  ;;  %s1155_s20 = smov %s832_s21 }
 0x10a   : > { %s1156_s21 = smov %s1158_s10  ;;  %21 = sbr.rel (!%p19_p4) target bundleno = 9 (0x9), region = 89 }
 0x111   :  { %507 = vsyncpa [#allocation4], 1 }
 0x112   :  { %509 = vsyncpa [#allocation4 + $0x1], 1 }
 0x113   :  { %510 = vsyncpa [#allocation5], 1 }
 0x114   :  { %512 = vsyncpa [#allocation5 + $0x1], 1 }
 0x115   :  { %513 = vsyncpa [#allocation6], 1 }
 0x116   :  { %515 = vsyncpa [#allocation6 + $0x1], 1 }

</bundles_post_ra>
